<compile_context>
chip_gen: v6e
topology: v6e:2x2x1
jax: 0.10.0
libtpu: 0.0.40
codegen_flags: <defaults>
</compile_context>

<pallas_src>
import functools
import math

import jax
import jax.numpy as jnp
from jax.experimental import pallas as pl
from jax.experimental.pallas import tpu as pltpu

EPS = 1e-5  # nn.LayerNorm default


def _prenorm_linear_kernel(x_ref, gamma_ref, beta_ref, w_ref, b_ref, o_ref,
                           *, mxu_dtype):
    # x_ref: (tm, D) token tile; w_ref: (tn, D) weight tile in PyTorch
    # (out, in) layout; b_ref: (1, tn); o_ref: (tm, tn).
    x = x_ref[...].astype(jnp.float32)                       # (tm, D)
    d = x.shape[-1]

    # --- LayerNorm over last dim: one-pass sum / sum-of-squares, f32 stats ---
    inv_d = jnp.float32(1.0 / d)
    s1 = jnp.sum(x, axis=-1, keepdims=True)                  # (tm, 1)
    s2 = jnp.sum(x * x, axis=-1, keepdims=True)              # (tm, 1)
    mean = s1 * inv_d
    var = jnp.maximum(s2 * inv_d - mean * mean, 0.0)
    inv = jax.lax.rsqrt(var + EPS)
    y = (x - mean) * inv * gamma_ref[...].astype(jnp.float32) \
        + beta_ref[...].astype(jnp.float32)                  # (tm, D)

    # --- fn: Linear(dim, dim) -> y @ W^T + b (W stays in (out, in) layout) ---
    # Contract y axis 1 with W axis 1 ("trans_b" form): MXU takes the
    # transposed operand directly, f32 accumulator.
    y = y.astype(mxu_dtype)
    w = w_ref[...]
    if w.dtype != jnp.dtype(mxu_dtype):
        w = w.astype(mxu_dtype)
    out = jax.lax.dot_general(
        y, w, dimension_numbers=(((1,), (1,)), ((), ())),
        preferred_element_type=jnp.float32)                  # (tm, tn)
    out = out + b_ref[...].astype(jnp.float32)

    o_ref[...] = out.astype(o_ref.dtype)


def _round_up(x, m):
    return (x + m - 1) // m * m


@functools.partial(jax.jit, static_argnames=("block_m", "block_n", "mxu_dtype"))
def prenorm_linear(x, gamma, beta, w, b, *, block_m=512, block_n=None,
                   mxu_dtype=jnp.bfloat16):
    """PreNorm(dim, Linear(dim, dim)) forward.

    x: (..., D); gamma/beta: (D,) LayerNorm affine; w: (D, D) PyTorch
    (out, in) layout; b: (D,).
    """
    orig_shape = x.shape
    D = orig_shape[-1]
    M = math.prod(orig_shape[:-1])
    xf = x.reshape(M, D)

    # Lane-dense (1, D) params (cheap layout plumbing; the big weight operand
    # is NOT copied / transposed here).
    gamma2 = gamma.reshape(1, D)
    beta2 = beta.reshape(1, D)
    b2 = b.reshape(1, D)

    # --- per-generation VMEM budget ----------------------------------------
    try:
        vmem_cap = int(pltpu.get_tpu_info().vmem_capacity_bytes)
    except Exception:
        vmem_cap = 64 << 20              # conservative: v7x per-TC VMEM
    cap = vmem_cap * 3 // 4              # headroom for Mosaic internal scratch

    # --- token (M) tiling ----------------------------------------------------
    block_m = max(8, _round_up(block_m, 8))
    if M > block_m:
        tm = block_m
    elif M > 8:
        # Keep >= 2 grid steps on the "parallel" axis so both v7x TCs get work.
        tm = _round_up(pl.cdiv(M, 2), 8)
    else:
        tm = M                           # single tile == full dim (allowed)

    # --- output-N / weight tiling --------------------------------------------
    w_bytes = jnp.dtype(w.dtype).itemsize
    if block_n is not None:
        tn = min(block_n, D)
    elif 2 * D * D * w_bytes <= cap // 2 or D <= 128:
        tn = D                           # whole weight stays VMEM-resident
    else:
        # Largest multiple of 128 whose double-buffered (tn, D) slab fits half
        # the budget; the N axis then streams the weight from HBM per M tile.
        tn = min(D, max(128, ((cap // 2) // (2 * D * w_bytes)) // 128 * 128))

    grid = (pl.cdiv(M, tm), pl.cdiv(D, tn))

    # --- VMEM accounting: everything double-buffered + kernel temporaries ----
    x_bytes = jnp.dtype(x.dtype).itemsize
    p_bytes = jnp.dtype(gamma.dtype).itemsize
    mxu_bytes = jnp.dtype(mxu_dtype).itemsize
    pipeline = 2 * (tm * D * x_bytes         # x tiles
                    + tm * tn * x_bytes      # out tiles
                    + tn * D * w_bytes       # weight tiles (resident or streamed)
                    + 2 * D * p_bytes        # gamma + beta
                    + tn * p_bytes)          # bias
    temps = (tm * D * 4                      # f32 x / LN intermediates
             + tm * D * mxu_bytes            # cast LN output
             + tn * D * mxu_bytes            # cast weight tile
             + tm * tn * 4)                  # f32 matmul accumulator
    est = pipeline + temps
    vmem_limit = int(max(min(est * 3 // 2, cap), min(32 << 20, cap)))

    kernel = functools.partial(_prenorm_linear_kernel, mxu_dtype=mxu_dtype)

    out = pl.pallas_call(
        kernel,
        out_shape=jax.ShapeDtypeStruct((M, D), x.dtype),
        grid_spec=pltpu.PrefetchScalarGridSpec(
            num_scalar_prefetch=0,
            grid=grid,
            in_specs=[
                pl.BlockSpec((tm, D), lambda i, j: (i, 0)),   # x token tile
                pl.BlockSpec((1, D), lambda i, j: (0, 0)),    # LN gamma
                pl.BlockSpec((1, D), lambda i, j: (0, 0)),    # LN beta
                pl.BlockSpec((tn, D), lambda i, j: (j, 0)),   # W (out, in) tile
                pl.BlockSpec((1, tn), lambda i, j: (0, j)),   # Linear bias tile
            ],
            out_specs=pl.BlockSpec((tm, tn), lambda i, j: (i, j)),
        ),
        compiler_params=pltpu.CompilerParams(
            dimension_semantics=("parallel", "arbitrary"),
            vmem_limit_bytes=vmem_limit),
    )(xf, gamma2, beta2, w, b2)

    return out.reshape(orig_shape)


def prenorm_reference(x, gamma, beta, w, b, mxu_dtype=jnp.float32):
    """Pure-JAX reference mirroring the kernel's precision policy."""
    orig_shape = x.shape
    D = orig_shape[-1]
    xf = x.reshape(-1, D).astype(jnp.float32)
    mean = jnp.mean(xf, axis=-1, keepdims=True)
    var = jnp.mean((xf - mean) ** 2, axis=-1, keepdims=True)
    y = (xf - mean) * jax.lax.rsqrt(var + EPS) * gamma + beta
    y = y.astype(mxu_dtype)
    wt = w.astype(mxu_dtype)
    out = jax.lax.dot_general(y, wt, (((1,), (1,)), ((), ())),
                              preferred_element_type=jnp.float32,
                              precision=jax.lax.Precision.HIGHEST)
    out = out + b.astype(jnp.float32)
    return out.astype(x.dtype).reshape(orig_shape)


if __name__ == "__main__":
    B, S, D = 2, 8, 32
    key = jax.random.PRNGKey(0)
    kx, kg, kbt, kw, kb = jax.random.split(key, 5)

    x = jax.random.normal(kx, (B, S, D), dtype=jnp.float32)
    gamma = 1.0 + 0.1 * jax.random.normal(kg, (D,), dtype=jnp.float32)
    beta = 0.1 * jax.random.normal(kbt, (D,), dtype=jnp.float32)
    # Linear(dim, dim) params, PyTorch layout (out, in).
    w = jax.random.normal(kw, (D, D), dtype=jnp.float32) * 0.05
    b = jax.random.normal(kb, (D,), dtype=jnp.float32) * 0.05

    # 1) Default path: bf16 MXU operands, f32 LN stats + f32 accumulation.
    out = jax.block_until_ready(prenorm_linear(x, gamma, beta, w, b))
    ref_bf16 = prenorm_reference(x, gamma, beta, w, b, mxu_dtype=jnp.bfloat16)
    assert out.shape == (B, S, D)
    assert jnp.allclose(out, ref_bf16, atol=5e-3, rtol=5e-3), "bf16 path mismatch"

    # 2) Full-f32 MXU path (opt-out of the bf16 cast).
    out_f32 = jax.block_until_ready(
        prenorm_linear(x, gamma, beta, w, b, mxu_dtype=jnp.float32))
    ref_f32 = prenorm_reference(x, gamma, beta, w, b, mxu_dtype=jnp.float32)
    assert jnp.allclose(out_f32, ref_f32, atol=1e-2, rtol=1e-2), "f32 path mismatch"

    # 3) Ragged token tiling + output-N tiling (no wrapper pad / slice).
    B2, S2, D2 = 3, 100, 256     # 300 tokens -> 3 tiles of 128; 2 N tiles of 128
    x2 = jax.random.normal(kx, (B2, S2, D2), dtype=jnp.float32)
    g2 = 1.0 + 0.1 * jax.random.normal(kg, (D2,), dtype=jnp.float32)
    bt2 = 0.1 * jax.random.normal(kbt, (D2,), dtype=jnp.float32)
    w2 = jax.random.normal(kw, (D2, D2), dtype=jnp.float32) * 0.03
    b2v = jax.random.normal(kb, (D2,), dtype=jnp.float32) * 0.03
    out2 = jax.block_until_ready(
        prenorm_linear(x2, g2, bt2, w2, b2v, block_m=128, block_n=128))
    ref2 = prenorm_reference(x2, g2, bt2, w2, b2v, mxu_dtype=jnp.bfloat16)
    assert out2.shape == (B2, S2, D2)
    assert jnp.allclose(out2, ref2, atol=2e-2, rtol=2e-2), "tiled path mismatch"

    print("KERNEL_OK")
</pallas_src>

<mosaic_0001>
module attributes {stable_mosaic.version = 11 : i64} {
  func.func @_prenorm_linear_kernel(%arg0: i32, %arg1: i32, %arg2: memref<8x32xf32, #tpu.memory_space<vmem>>, %arg3: memref<1x32xf32, #tpu.memory_space<vmem>>, %arg4: memref<1x32xf32, #tpu.memory_space<vmem>>, %arg5: memref<32x32xf32, #tpu.memory_space<vmem>>, %arg6: memref<1x32xf32, #tpu.memory_space<vmem>>, %arg7: memref<8x32xf32, #tpu.memory_space<vmem>>) attributes {dimension_semantics = [#tpu.dimension_semantics<parallel>, #tpu.dimension_semantics<arbitrary>], iteration_bounds = array<i64: 2, 1>, scalar_prefetch = 0 : i64, scratch_operands = 0 : i64, tpu.core_type = #tpu.core_type<tc>, window_params = [{transform_indices = @transform_0, window_bounds = array<i64: 8, 32>}, {pipeline_mode = #tpu.pipeline_mode<synchronous>, transform_indices = @transform_1, window_bounds = array<i64: 1, 32>}, {pipeline_mode = #tpu.pipeline_mode<synchronous>, transform_indices = @transform_2, window_bounds = array<i64: 1, 32>}, {transform_indices = @transform_3, window_bounds = array<i64: 32, 32>}, {transform_indices = @transform_4, window_bounds = array<i64: 1, 32>}, {transform_indices = @transform_5, window_bounds = array<i64: 8, 32>}]} {
    %c0 = arith.constant 0 : index
    %c0_0 = arith.constant 0 : index
    %0 = vector.load %arg2[%c0, %c0_0] : memref<8x32xf32, #tpu.memory_space<vmem>>, vector<8x32xf32>
    %cst = arith.constant dense<0.000000e+00> : vector<8xf32>
    %1 = vector.multi_reduction <add>, %0, %cst [1] : vector<8x32xf32> to vector<8xf32>
    %2 = vector.shape_cast %1 : vector<8xf32> to vector<8x1xf32>
    %3 = arith.mulf %0, %0 : vector<8x32xf32>
    %cst_1 = arith.constant dense<0.000000e+00> : vector<8xf32>
    %4 = vector.multi_reduction <add>, %3, %cst_1 [1] : vector<8x32xf32> to vector<8xf32>
    %5 = vector.shape_cast %4 : vector<8xf32> to vector<8x1xf32>
    %cst_2 = arith.constant 3.125000e-02 : f32
    %6 = vector.broadcast %cst_2 : f32 to vector<8x1xf32>
    %7 = arith.mulf %2, %6 : vector<8x1xf32>
    %cst_3 = arith.constant 3.125000e-02 : f32
    %8 = vector.broadcast %cst_3 : f32 to vector<8x1xf32>
    %9 = arith.mulf %5, %8 : vector<8x1xf32>
    %10 = arith.mulf %7, %7 : vector<8x1xf32>
    %11 = arith.subf %9, %10 : vector<8x1xf32>
    %cst_4 = arith.constant 0.000000e+00 : f32
    %12 = vector.broadcast %cst_4 : f32 to vector<8x1xf32>
    %13 = arith.maximumf %11, %12 : vector<8x1xf32>
    %cst_5 = arith.constant 9.99999974E-6 : f32
    %14 = vector.broadcast %cst_5 : f32 to vector<8x1xf32>
    %15 = arith.addf %13, %14 : vector<8x1xf32>
    %16 = math.rsqrt %15 : vector<8x1xf32>
    %17 = vector.broadcast %7 : vector<8x1xf32> to vector<8x32xf32>
    %18 = arith.subf %0, %17 : vector<8x32xf32>
    %19 = vector.broadcast %16 : vector<8x1xf32> to vector<8x32xf32>
    %20 = arith.mulf %18, %19 : vector<8x32xf32>
    %c0_6 = arith.constant 0 : index
    %c0_7 = arith.constant 0 : index
    %21 = vector.load %arg3[%c0_6, %c0_7] : memref<1x32xf32, #tpu.memory_space<vmem>>, vector<1x32xf32>
    %22 = vector.broadcast %21 : vector<1x32xf32> to vector<8x32xf32>
    %23 = arith.mulf %20, %22 : vector<8x32xf32>
    %c0_8 = arith.constant 0 : index
    %c0_9 = arith.constant 0 : index
    %24 = vector.load %arg4[%c0_8, %c0_9] : memref<1x32xf32, #tpu.memory_space<vmem>>, vector<1x32xf32>
    %25 = vector.broadcast %24 : vector<1x32xf32> to vector<8x32xf32>
    %26 = arith.addf %23, %25 : vector<8x32xf32>
    %27 = arith.truncf %26 : vector<8x32xf32> to vector<8x32xbf16>
    %c0_10 = arith.constant 0 : index
    %c0_11 = arith.constant 0 : index
    %28 = vector.load %arg5[%c0_10, %c0_11] : memref<32x32xf32, #tpu.memory_space<vmem>>, vector<32x32xf32>
    %29 = arith.truncf %28 : vector<32x32xf32> to vector<32x32xbf16>
    %cst_12 = arith.constant dense<0.000000e+00> : vector<8x32xf32>
    %30 = tpu.matmul %27, %29, %cst_12 {dimension_numbers = #tpu.dot_dimension_numbers<[1], [1], [0], [0], [0, 0, 1, 0], [], []>} : vector<8x32xbf16>, vector<32x32xbf16>, vector<8x32xf32> -> vector<8x32xf32>
    %c0_13 = arith.constant 0 : index
    %c0_14 = arith.constant 0 : index
    %31 = vector.load %arg6[%c0_13, %c0_14] : memref<1x32xf32, #tpu.memory_space<vmem>>, vector<1x32xf32>
    %32 = vector.broadcast %31 : vector<1x32xf32> to vector<8x32xf32>
    %33 = arith.addf %30, %32 : vector<8x32xf32>
    %c0_15 = arith.constant 0 : index
    %c0_16 = arith.constant 0 : index
    %34 = vector.load %arg7[%c0_15, %c0_16] : memref<8x32xf32, #tpu.memory_space<vmem>>, vector<8x32xf32>
    tpu.vector_store %arg7[%c0_15, %c0_16], %33 {strides = array<i32>} : memref<8x32xf32, #tpu.memory_space<vmem>>, vector<8x32xf32>,
    return
  }
  func.func @transform_0(%arg0: i32, %arg1: i32) -> (i32, i32) {
    %c0_i32 = arith.constant 0 : i32
    %c0_i32_0 = arith.constant 0 : i32
    return %arg0, %c0_i32 : i32, i32
  }
  func.func @transform_1(%arg0: i32, %arg1: i32) -> (i32, i32) {
    %c0_i32 = arith.constant 0 : i32
    %c0_i32_0 = arith.constant 0 : i32
    %c0_i32_1 = arith.constant 0 : i32
    return %c0_i32, %c0_i32_0 : i32, i32
  }
  func.func @transform_2(%arg0: i32, %arg1: i32) -> (i32, i32) {
    %c0_i32 = arith.constant 0 : i32
    %c0_i32_0 = arith.constant 0 : i32
    %c0_i32_1 = arith.constant 0 : i32
    return %c0_i32, %c0_i32_0 : i32, i32
  }
  func.func @transform_3(%arg0: i32, %arg1: i32) -> (i32, i32) {
    %c0_i32 = arith.constant 0 : i32
    %c0_i32_0 = arith.constant 0 : i32
    return %arg1, %c0_i32 : i32, i32
  }
  func.func @transform_4(%arg0: i32, %arg1: i32) -> (i32, i32) {
    %c0_i32 = arith.constant 0 : i32
    %c0_i32_0 = arith.constant 0 : i32
    return %c0_i32, %arg1 : i32, i32
  }
  func.func @transform_5(%arg0: i32, %arg1: i32) -> (i32, i32) {
    %c0_i32 = arith.constant 0 : i32
    return %arg0, %arg1 : i32, i32
  }
}

</mosaic_0001>

<bundles_post_ra>
// kernel: prenorm_linear.1
= control target key start
LH: loop header
LB: loop body
LE: loop exit
PB: predicated region body
PF: predicated region fallthrough
CT: control target
= control target key end

     0   :  { %s994_s0 = inlined_call_operand.hbm [shape: f32[16,32], index: 0, kind: input, shape index: {}]   ;;  %s995_s1 = inlined_call_operand.vmem [shape: f32[1,32], index: 1, kind: input, shape index: {}]   ;;  %s996_s2 = inlined_call_operand.vmem [shape: f32[1,32], index: 2, kind: input, shape index: {}]   ;;  %s997_s3 = inlined_call_operand.hbm [shape: f32[32,32], index: 3, kind: input, shape index: {}]   ;;  %s998_s4 = inlined_call_operand.vmem [shape: f32[1,32], index: 4, kind: input, shape index: {}]   ;;  %s999_s5 = inlined_call_operand.hbm [shape: f32[16,32], index: 5, kind: output, shape index: {}]  }
   0x1   :  { %1002 = sst [smem:[#allocation12_spill]] %s997_s3 }
   0x2   :  { %10 = vsyncpa [#allocation3], 0 }
   0x3   :  { %12 = vsyncpa [#allocation3 + $0x1], 0 }
   0x4   :  { %13 = vsyncpa [#allocation6], 0 }
   0x5   :  { %14 = vsyncpa [#allocation4], 0 }
   0x6   :  { %16 = vsyncpa [#allocation4 + $0x1], 0  ;;  %s796_s18 = smov 0   ;;  %s798_s19 = smov 0  }
   0x7   :  { %s800_s20 = smov 0   ;;  %s802_s21 = smov 0  }
   0x8   :  { %s804_s22 = smov 0   ;;  %s806_s23 = smov 0  }
   0x9 LB: > { %s509_s24 = sadd.s32 4294967295, %s757_s23   ;;  %s510_s25 = sadd.s32 4294967294, %s757_s23   ;;  %s757_s23 = sphi %s806_s23, %s22_s23   ;;  %s753_s22 = sphi %s804_s22, %s1022_s22   ;;  %s749_s21 = sphi %s802_s21, %s1021_s21   ;;  %s745_s20 = sphi %s800_s20, %s1020_s20   ;;  %s741_s19 = sphi %s798_s19, %s1019_s19   ;;  %s737_s18 = sphi %s796_s18, %s1018_s18  }
   0xa   : > { %p54_p0 = scmp.ne.s32.totalorder %s741_s19, %s737_s18  ;;  %p830_p1 = scmp.eq.s32.totalorder %s509_s24, 0 }
   0xb   : > { %p834_p2 = scmp.eq.s32.totalorder %s509_s24, 1  ;;  %p180_p3 = scmp.eq.s32.totalorder %s510_s25, 1 }
   0xc   : > { %p840_p4 = por %p830_p1, %p54_p0  ;;  %p511_p5 = scmp.ge.s32.totalorder %s757_s23, 1 }
   0xd   : > { %p845_p6 = por %p180_p3, %p54_p0  ;;  %p187_p7 = scmp.lt.s32.totalorder %s757_s23, 3 }
   0xe   : > { %s1005_s28 = scalar_select %p840_p4, 1, 0 }
   0xf   : > { %s1006_s29 = scalar_select %p845_p6, 1, 0 }
  0x10   : > { %p850_p8 = pnand %p511_p5, %p187_p7  ;;  %s759_s6 = smov [#allocation5]  }
  0x11   : > { %s208_s7 = sshll.u32 %s759_s6, 4  ;;  %s34_s9 = sadd.s32 1, %s753_s22  ;;  %s209_s7 = int_to_ptr.vmem [resolvable:$true] %s208_s7 }
  0x12   : > { %p548_p9 = pneg %p850_p8  ;;  %s630_s10 = scalar_lea.vmem %s209_s7, 512 }
  0x13   : > { %p631_p13 = scmp.ne.s32.totalorder %s209_s7, %s630_s10  ;;  %p638_p5 = scmp.lt.s32.totalorder %s209_s7, %s209_s7 }
  0x14   : > { %p859_p11 = pnand %p548_p9, %p830_p1  ;;  %p639_p7 = scmp.lt.s32.totalorder %s630_s10, %s630_s10 }
  0x16   : > { %p621_p12 = pneg %p859_p11  ;;  %p640_p6 = por %p639_p7, %p638_p5 }
  0x18   : > { %p633_p0 = pnand %p631_p13, %p621_p12 }
  0x1a   : > { %p634_p3 = pneg %p633_p0 }
  0x1c   : > { %p641_p4 = pnand %p640_p6, %p634_p3 }
  0x1e   : > { %644 = shalt.err (!%p641_p4)
}
  0x1f   : > { %s760_s11 = smov 128   ;;  %s761_s12 = smov 8  }
  0x20   : > { %s1009_s3 = sld [smem:[#allocation12_spill]]  ;;  %p36_p6 = scmp.ge.s32.totalorder %s34_s9, 2 }
  0x21   : > { %s41_s15 = sadd.s32 1, %s745_s20  ;;  %p48_p4 = scmp.ne.s32.totalorder %s745_s20, %s741_s19 }
  0x22   : > { %p49_p9 = scmp.eq.s32.totalorder %s757_s23, 0  ;;  %s1024_s9 = smov (%p36_p6, %s34_s9), 0 }
  0x23   : > { %1010 = sst [smem:[#allocation11_spill]] %s1024_s9  ;;  %p883_p13 = por %p834_p2, %p48_p4 }
  0x24   : > { %p877_p12 = por %p49_p9, %p48_p4  ;;  %s38_s24 = ssub.s32 %s753_s22, %s1024_s9 }
  0x25   : > { %p561_p0 = scmp.lt.s32.totalorder %s757_s23, 2  ;;  %s228_s25 = sand.u32 1, %s745_s20  }
  0x26   : > { %551 = dma.hbm_to_vmem [thread:$0]  (!%p859_p11), %s1009_s3, 512, %s209_s7, [#allocation6], %s760_s11, %s760_s11, %s761_s12  }
  0x27   : > { %p39_p11 = scmp.eq.s32.totalorder %s38_s24, 0  ;;  %s515_s6 = sshll.u32 %s228_s25, 3 }
  0x28   : > { %s516_s8 = sshll.u32 %s753_s22, 7  ;;  %s232_s13 = scalar_lea.vmem [#allocation2], %s515_s6 }
  0x29   : > { %s892_s7 = scalar_select %p39_p11, %s745_s20, %s41_s15  }
  0x2a   : > { %s237_s12 = scalar_lea.hbm %s994_s0, %s516_s8  ;;  %s239_s14 = sshll.u32 %s232_s13, 4  ;;  %s240_s14 = int_to_ptr.vmem [resolvable:$true] %s239_s14 }
  0x2b   : > { %p900_p2 = pnand %p561_p0, %p877_p12  ;;  %s229_s3 = scalar_lea.sflag [#allocation3], %s228_s25 }
  0x2c   : > { %s658_s24 = scalar_lea.vmem %s240_s14, 128  ;;  %s762_s15 = smov [#allocation2]  }
  0x2d   : > { %p647_p3 = pneg %p900_p2  ;;  %p659_p5 = scmp.ne.s32.totalorder %s240_s14, %s658_s24 }
  0x2e   : > { %s663_s9 = sshll.u32 %s762_s15, 4  ;;  %s664_s9 = int_to_ptr.vmem [resolvable:$false] %s663_s9 }
  0x2f   : > { %p661_p7 = pnand %p659_p5, %p647_p3  ;;  %s665_s8 = scalar_lea.vmem %s664_s9, 256 }
  0x30   : > { %p666_p4 = scmp.lt.s32.totalorder %s240_s14, %s664_s9  ;;  %p667_p9 = scmp.lt.s32.totalorder %s665_s8, %s658_s24 }
  0x31   : > { %p662_p6 = pneg %p661_p7 }
  0x32   : > { %p668_p11 = por %p667_p9, %p666_p4 }
  0x34   : > { %p669_p10 = pnand %p668_p11, %p662_p6 }
  0x36   : > { %672 = shalt.err (!%p669_p10)
}
  0x37   : > { %555 = dma.hbm_to_vmem [thread:$0]  (!%p900_p2), %s237_s12, 128, %s240_s14, %s229_s3  }
  0x38   : > { %248 = sbr.rel (%p850_p8) target bundleno = 447 (0x1bf), region = 40  ;;  %s911_s16 = sand.u32 (!%p850_p8), 1, %s741_s19  }
  0x39   : > { %s518_s25 = sshll.u32 (!%p850_p8), %s911_s16, 3  ;;  %s251_s6 = scalar_lea.sflag (!%p850_p8), [#allocation3], %s911_s16 }
  0x3a   : > { %s254_s9 = scalar_lea.vmem (!%p850_p8), [#allocation2], %s518_s25  ;;  %p1014_p12 = scmp.ne.s32.totalorder (!%p850_p8), %s1005_s28, 0 }
  0x3d   : > { %724 = dma.done.wait (%p1014_p12), %s251_s6, 128  }
  0x3e   : > { %726 = vsyncadd (%p1014_p12), %s251_s6, 4294967168 }
  0x3f   : > { %728 = dma.done.wait (%p830_p1), [#allocation6], 512  }
  0x40   : > { %730 = vsyncadd (%p830_p1), [#allocation6], 4294966784  ;;  %vm294_vm0 = vcmask 261120   ;;  %v293_v0 = vld [vmem:[%s254_s9] sm:$0xff]  ;;  %v763_v6 = vmov 0.0   ;;  %vm764_vm1 = vmmov 0  }
  0x41   : > { %v295_v1 = vsel %vm294_vm0, %v293_v0, 0.0  ;;  %v298_v2 = vmul.f32 %v293_v0, %v293_v0  ;;  %v330_v4 = vld [vmem:[#allocation5 + $0x10] sm:$0xff]  ;;  %v331_v5 = vld [vmem:[#allocation5 + $0x18] sm:$0xff]  ;;  %532 = vmatprep.subr.bf16.mxu0 %v763_v6  ;;  %536 = vmatprep.mubr.msk.bf16.mxu0 %vm764_vm1, %v763_v6  ;;  %v328_v8 = vld [vmem:[#allocation5] sm:$0xff]  ;;  %s526_s12 = sshll.u32 %s749_s21, 7  ;;  %s287_s13 = scalar_lea.vmem [#allocation7], %s518_s25 }
  0x42   : > { %296 = vadd.xlane.f32.xlu0 %v295_v1  ;;  %v333_v7 = vpack.c.bf16 %v331_v5, %v330_v4  ;;  %v329_v9 = vld [vmem:[#allocation5 + $0x8] sm:$0xff]  ;;  %v521_v23 = vld [vmem:[%s995_s1] ss:$0 sm:$0xff]  ;;  %s406_s14 = sshll.u32 %s287_s13, 4  ;;  %s945_s15 = scalar_lea.hbm %s999_s5, %s526_s12  ;;  %s947_s14 = int_to_ptr.vmem [resolvable:$true] %s406_s14 }
  0x43   : > { %v299_v3 = vsel %vm294_vm0, %v298_v2, 0.0  ;;  %v332_v11 = vpack.c.bf16 %v329_v9, %v328_v8  ;;  %v522_v25 = vld [vmem:[%s996_s2] ss:$0 sm:$0xff]  ;;  %s392_s21 = scalar_lea.sflag [#allocation4], %s911_s16  ;;  %s673_s8 = scalar_lea.vmem %s947_s14, 128 }
  0x44   : > { %v348_v10 = vsel %vm294_vm0, %v333_v7, 0  ;;  %v523_v29 = vld [vmem:[%s998_s4] ss:$0 sm:$0xff]  ;;  %p674_p1 = scmp.ne.s32.totalorder %s947_s14, %s673_s8  ;;  %s765_s25 = smov [#allocation7]  }
  0x45   : > { %533 = vmatpush3.bf16.xpose.msra.mxu0 %v348_v10  ;;  %v345_v12 = vsel %vm294_vm0, %v332_v11, 0  ;;  %s677_s6 = sshll.u32 %s765_s25, 4  ;;  %s678_s6 = int_to_ptr.vmem [resolvable:$false] %s677_s6 }
  0x46   : > { %300 = vadd.xlane.f32.xlu0 %v299_v3  ;;  %534 = vmatprep.subr.bf16.mxu0 %v763_v6  ;;  %p675_p8 = pnand %p674_p1, %p883_p13  ;;  %s679_s9 = scalar_lea.vmem %s678_s6, 256 }
  0x47   : > { %p680_p0 = scmp.lt.s32.totalorder %s947_s14, %s678_s6  ;;  %p681_p2 = scmp.lt.s32.totalorder %s679_s9, %s673_s8 }
  0x48   : > { %p676_p10 = pneg %p675_p8 }
  0x49   : > { %p682_p3 = por %p681_p2, %p680_p0 }
  0x4b   : > { %p683_p5 = pnand %p682_p3, %p676_p10 }
  0x4d   : > { %535 = vmatpush3.bf16.xpose.msra.mxu0 %v345_v12 }
  0xcb   : > { %v297_v13 = vpop.xlane.xlu0 %296 }
  0xcc   : > { %v302_v14 = vmul.f32 0.03125, %v297_v13 }
  0xce   : > { %v304_v16 = vmul.f32 %v302_v14, %v302_v14  ;;  %v309_v21 = vsub.f32 %v293_v0, %v302_v14 }
  0xcf   : > { %v301_v15 = vpop.xlane.xlu0 %300 }
  0xd0   : > { %v303_v17 = vmul.f32 0.03125, %v301_v15 }
  0xd2   : > { %v305_v18 = vsub.f32 %v303_v17, %v304_v16 }
  0xd4   : > { %v306_v19 = vmax.f32 %v305_v18, 0.0 }
  0xd6   : > { %v307_v20 = vadd.f32 1e-05, %v306_v19 }
  0xd8   : > { %617 = vrsqrt.f32 %v307_v20 }
  0xe5   : > { %v618_v22 = vpop.eup %617 }
  0xe6   : > { %v310_v24 = vmul.f32 %v618_v22, %v309_v21 }
  0xe8   : > { %v318_v26 = vmul.f32 %v521_v23, %v310_v24 }
  0xea   : > { %v326_v27 = vadd.f32 %v522_v25, %v318_v26 }
  0xec   : > { %v327_v28 = vpack.c.bf16 %v326_v27, %v326_v27 }
  0xee   : > { %537 = vmatmul.mubr.msk.bf16.vlgmr.msra.gmra.mxu0 %vm294_vm0, %v327_v28 }
 0x1ae   : > { %v384_v30 = vpop.f32.mrf.mxu0 }
 0x1af   : > { %v385_v31 = vadd.f32 %v523_v29, %v384_v30 }
 0x1b0   : > { %v538_v32 = vpop.f32.mrf.mxu0 }
 0x1b1   : > { %390 = vst.msk [vmem:[%s287_s13] sm:$0xff] %vm294_vm0, %v385_v31 }
 0x1b2   : > { %v387_v33 = vpop.f32.mrf.mxu0 }
 0x1b3   : > { %686 = shalt.err (!%p683_p5)
}
 0x1b4   : > { %s687_s3 = scalar_lea.hbm %s945_s15, 128  ;;  %s691_s28 = scalar_lea.hbm %s999_s5, 256 }
 0x1b5   : > { %p688_p7 = scmp.ne.s32.totalorder %s945_s15, %s687_s3  ;;  %p692_p9 = scmp.lt.s32.totalorder %s945_s15, %s999_s5 }
 0x1b6   : > { %p693_p11 = scmp.lt.s32.totalorder %s691_s28, %s687_s3 }
 0x1b7   : > { %p689_p6 = pnand %p688_p7, %p883_p13 }
 0x1b8   : > { %p694_p12 = por %p693_p11, %p692_p9 }
 0x1b9   : > { %p690_p4 = pneg %p689_p6 }
 0x1bb   : > { %p695_p1 = pnand %p694_p12, %p690_p4 }
 0x1bd   : > { %698 = shalt.err (!%p695_p1)
}
 0x1be   : > { %546 = dma.vmem_to_hbm [thread:$0]  (%p883_p13), %s947_s14, 128, %s945_s15, %s392_s21   ;;  %v539_v34 = vpop.f32.mrf.mxu0 }
 0x1bf PF: > { %s418_s11 = sand.u32 1, %s737_s18   ;;  %p1015_p8 = scmp.ne.s32.totalorder %s1006_s29, 0 }
 0x1c0   : > { %p1016_p10 = scmp.ge.s32.totalorder %s757_s23, 2  ;;  %s419_s12 = scalar_lea.sflag [#allocation4], %s418_s11 }
 0x1c2   : > { %p557_p0 = pnand %p1016_p10, %p1015_p8 }
 0x1c4   : > { %p558_p2 = pneg %p557_p0 }
 0x1c6   : > { %732 = dma.done.wait (%p558_p2), %s419_s12, 128  }
 0x1c7   : > { %734 = vsyncadd (%p558_p2), %s419_s12, 4294967168  ;;  %s22_s23 = sadd.s32 1, %s757_s23   ;;  %s1017_s17 = sld [smem:[#allocation11_spill]] }
 0x1c8   : > { %p19_p3 = scmp.ge.s32.totalorder %s22_s23, 4   ;;  %s1018_s18 = smov %s741_s19 }
 0x1c9   : > { %s1019_s19 = smov %s745_s20  ;;  %s1020_s20 = smov %s892_s7 }
 0x1ca   : > { %s1021_s21 = smov %s753_s22  ;;  %21 = sbr.rel (!%p19_p3) target bundleno = 9 (0x9), region = 93 }
 0x1cd   : > { %s1022_s22 = smov %s1017_s17 }
 0x1cf   :  { %424 = vsyncpa [#allocation3], 1 }
 0x1d0   :  { %426 = vsyncpa [#allocation3 + $0x1], 1 }
 0x1d1   :  { %427 = vsyncpa [#allocation6], 1 }
 0x1d2   :  { %428 = vsyncpa [#allocation4], 1 }
 0x1d3   :  { %430 = vsyncpa [#allocation4 + $0x1], 1 }

</bundles_post_ra>
